<compile_context>
chip_gen: v6e
topology: v6e:2x2x1
jax: 0.10.0
libtpu: 0.0.40
codegen_flags: <defaults>
</compile_context>

<pallas_src>
import jax
import jax.numpy as jnp
from jax.experimental import pallas as pl
from jax.experimental.pallas import tpu as pltpu

EPS = 1e-6


def _layernorm_kernel(x_ref, alpha_ref, bias_ref, o_ref):
    # x_ref: (TILE_ROWS, H) VMEM tile; alpha/bias: (1,) f32 scalars in SMEM.
    xin = x_ref[...]
    xf = xin.astype(jnp.float32)
    h = xf.shape[-1]

    # Fused single pass: sum(x) and sum(x*x) are independent row reductions.
    s = jnp.sum(xf, axis=-1, keepdims=True)
    sq = jnp.sum(xf * xf, axis=-1, keepdims=True)
    mean = s * jnp.float32(1.0 / h)
    # torch.std default is the unbiased estimator (divide by N-1).
    denom = jnp.float32(1.0 / max(h - 1, 1))  # h==1 clamped (torch -> NaN)
    var = (sq - jnp.float32(h) * mean * mean) * denom
    var = jnp.maximum(var, 0.0)  # guard tiny negatives from cancellation
    std = jnp.sqrt(var)

    inv = pl.reciprocal(std + jnp.float32(EPS), approx=False)  # exact, EUP path
    scale = alpha_ref[0] * inv              # (T, 1) per-row scale, alpha folded
    shift = bias_ref[0] - mean * scale      # (T, 1) per-row shift, bias folded

    if o_ref.dtype == jnp.bfloat16:
        # Reductions stayed in f32; final MAC runs on the native bf16 tile so
        # no second full f32 copy of x is materialized for the write-back path.
        o_ref[...] = xin * scale.astype(jnp.bfloat16) + shift.astype(jnp.bfloat16)
    else:
        o_ref[...] = (xf * scale + shift).astype(o_ref.dtype)


def _sublane_multiple(dtype):
    itemsize = jnp.dtype(dtype).itemsize
    return {4: 8, 2: 16, 1: 32}.get(itemsize, 8)


def _round_up(n, m):
    return ((n + m - 1) // m) * m


def _vmem_capacity_bytes():
    """Physical per-core VMEM (generation-aware), with a safe fallback."""
    try:
        cap = int(pltpu.get_tpu_info().vmem_capacity_bytes)
        if cap > 0:
            return cap
    except Exception:
        pass
    return 64 << 20  # conservative: v7x per-TC size; safe on v5e/v6e too


def _select_tile_rows(rows, h, dtype, vmem_budget_bytes, *,
                      target_step_bytes=8 << 20, min_grid_steps=8):
    """Row tile sized by a per-step byte target, clamped by VMEM and grid length."""
    sub = _sublane_multiple(dtype)
    itemsize = jnp.dtype(dtype).itemsize
    row_io_bytes = max(h * itemsize, 1)
    # VMEM per row: double-buffered in + out tiles plus ~2 f32 intermediates.
    per_row_vmem = max(h * (4 * itemsize + 2 * 4), 1)

    t = pl.cdiv(target_step_bytes, row_io_bytes)        # hit per-step byte target
    t = min(t, vmem_budget_bytes // per_row_vmem)       # stay inside VMEM budget
    # Keep >= min_grid_steps blocks: several blocks per TensorCore on v7x (2 TCs
    # share the parallel row axis) and pipeline overlap on single-TC v5e/v6e.
    t = min(t, max(pl.cdiv(rows, min_grid_steps), 1))
    t = max(sub, (t // sub) * sub)                      # sublane-aligned
    return int(t)


def layer_normalization(x, alpha, bias, *, tile_rows=None):
    """x: (..., H) float array; alpha, bias: shape (1,) parameters."""
    orig_shape = x.shape
    h = orig_shape[-1]
    x2d = x.reshape(-1, h)
    rows = x2d.shape[0]

    # ~75% of physical per-core VMEM: ≈48 MiB on v7x, ≈96 MiB on v5e/v6e.
    vmem_cap = (_vmem_capacity_bytes() * 3) // 4

    if tile_rows is None:
        tile_rows = _select_tile_rows(rows, h, x.dtype, vmem_cap)

    # Ragged last block handled by Pallas (rows are independent; padded rows in
    # the last block compute garbage that is never written back).
    grid = (pl.cdiv(rows, tile_rows),)

    itemsize = jnp.dtype(x.dtype).itemsize
    io_tile_bytes = tile_rows * h * itemsize
    f32_tile_bytes = tile_rows * h * 4
    needed = 4 * io_tile_bytes + 2 * f32_tile_bytes + (2 << 20)
    vmem_limit_bytes = int(min(vmem_cap, max(needed, 16 << 20)))

    # SMEM scalar path is 32-bit: cast params once on the host side.
    alpha32 = jnp.asarray(alpha, dtype=jnp.float32).reshape(1)
    bias32 = jnp.asarray(bias, dtype=jnp.float32).reshape(1)

    out = pl.pallas_call(
        _layernorm_kernel,
        out_shape=jax.ShapeDtypeStruct((rows, h), x.dtype),
        grid_spec=pltpu.PrefetchScalarGridSpec(
            num_scalar_prefetch=0,
            grid=grid,
            in_specs=[
                pl.BlockSpec((tile_rows, h), lambda i: (i, 0)),
                pl.BlockSpec(memory_space=pltpu.SMEM),
                pl.BlockSpec(memory_space=pltpu.SMEM),
            ],
            out_specs=pl.BlockSpec((tile_rows, h), lambda i: (i, 0)),
        ),
        compiler_params=pltpu.CompilerParams(
            dimension_semantics=("parallel",),
            vmem_limit_bytes=vmem_limit_bytes,
        ),
    )(x2d, alpha32, bias32)

    return out.reshape(orig_shape)


def _reference(x, alpha, bias):
    xf = x.astype(jnp.float32)
    mean = jnp.mean(xf, axis=-1, keepdims=True)
    var = jnp.sum((xf - mean) ** 2, axis=-1, keepdims=True) / (xf.shape[-1] - 1)
    std = jnp.sqrt(var)
    return (alpha[0] * (xf - mean) / (std + EPS) + bias[0]).astype(x.dtype)


if __name__ == "__main__":
    key = jax.random.PRNGKey(0)
    batch, seq, hidden = 2, 8, 32
    x = jax.random.normal(key, (batch, seq, hidden), dtype=jnp.float32)

    # Deterministic parameter init, matching nn.Parameter(torch.ones(1)/zeros(1)).
    alpha = jnp.ones((1,), dtype=jnp.float32)
    bias = jnp.zeros((1,), dtype=jnp.float32)

    out = layer_normalization(x, alpha, bias)
    out = jax.block_until_ready(out)

    ref = _reference(x, alpha, bias)
    assert out.shape == x.shape
    assert jnp.allclose(out, ref, atol=5e-5, rtol=5e-5)

    print("KERNEL_OK")
</pallas_src>

<mosaic_0001>
module attributes {stable_mosaic.version = 11 : i64} {
  func.func @_layernorm_kernel(%arg0: i32, %arg1: memref<8x32xf32, #tpu.memory_space<vmem>>, %arg2: memref<1xf32, #tpu.memory_space<smem>>, %arg3: memref<1xf32, #tpu.memory_space<smem>>, %arg4: memref<8x32xf32, #tpu.memory_space<vmem>>) attributes {dimension_semantics = [#tpu.dimension_semantics<parallel>], iteration_bounds = array<i64: 2>, scalar_prefetch = 0 : i64, scratch_operands = 0 : i64, tpu.core_type = #tpu.core_type<tc>, window_params = [{transform_indices = @transform_0, window_bounds = array<i64: 8, 32>}, {transform_indices = @transform_1, window_bounds = array<i64: 1>}, {transform_indices = @transform_2, window_bounds = array<i64: 1>}, {transform_indices = @transform_3, window_bounds = array<i64: 8, 32>}]} {
    %c0 = arith.constant 0 : index
    %c0_0 = arith.constant 0 : index
    %0 = vector.load %arg1[%c0, %c0_0] : memref<8x32xf32, #tpu.memory_space<vmem>>, vector<8x32xf32>
    %cst = arith.constant dense<0.000000e+00> : vector<8xf32>
    %1 = vector.multi_reduction <add>, %0, %cst [1] : vector<8x32xf32> to vector<8xf32>
    %2 = vector.shape_cast %1 : vector<8xf32> to vector<8x1xf32>
    %3 = arith.mulf %0, %0 : vector<8x32xf32>
    %cst_1 = arith.constant dense<0.000000e+00> : vector<8xf32>
    %4 = vector.multi_reduction <add>, %3, %cst_1 [1] : vector<8x32xf32> to vector<8xf32>
    %5 = vector.shape_cast %4 : vector<8xf32> to vector<8x1xf32>
    %cst_2 = arith.constant 3.125000e-02 : f32
    %6 = vector.broadcast %cst_2 : f32 to vector<8x1xf32>
    %7 = arith.mulf %2, %6 : vector<8x1xf32>
    %cst_3 = arith.constant 3.200000e+01 : f32
    %8 = vector.broadcast %cst_3 : f32 to vector<8x1xf32>
    %9 = arith.mulf %8, %7 : vector<8x1xf32>
    %10 = arith.mulf %9, %7 : vector<8x1xf32>
    %11 = arith.subf %5, %10 : vector<8x1xf32>
    %cst_4 = arith.constant 0.0322580636 : f32
    %12 = vector.broadcast %cst_4 : f32 to vector<8x1xf32>
    %13 = arith.mulf %11, %12 : vector<8x1xf32>
    %cst_5 = arith.constant 0.000000e+00 : f32
    %14 = vector.broadcast %cst_5 : f32 to vector<8x1xf32>
    %15 = arith.maximumf %13, %14 : vector<8x1xf32>
    %16 = math.sqrt %15 : vector<8x1xf32>
    %cst_6 = arith.constant 9.99999997E-7 : f32
    %17 = vector.broadcast %cst_6 : f32 to vector<8x1xf32>
    %18 = arith.addf %16, %17 : vector<8x1xf32>
    %19 = tpu.reciprocal %18 : vector<8x1xf32> -> vector<8x1xf32>
    %c0_7 = arith.constant 0 : index
    %20 = memref.load %arg2[%c0_7] : memref<1xf32, #tpu.memory_space<smem>>
    %21 = vector.broadcast %20 : f32 to vector<8x1xf32>
    %22 = arith.mulf %21, %19 : vector<8x1xf32>
    %c0_8 = arith.constant 0 : index
    %23 = memref.load %arg3[%c0_8] : memref<1xf32, #tpu.memory_space<smem>>
    %24 = arith.mulf %7, %22 : vector<8x1xf32>
    %25 = vector.broadcast %23 : f32 to vector<8x1xf32>
    %26 = arith.subf %25, %24 : vector<8x1xf32>
    %27 = vector.broadcast %22 : vector<8x1xf32> to vector<8x32xf32>
    %28 = arith.mulf %0, %27 : vector<8x32xf32>
    %29 = vector.broadcast %26 : vector<8x1xf32> to vector<8x32xf32>
    %30 = arith.addf %28, %29 : vector<8x32xf32>
    %c0_9 = arith.constant 0 : index
    %c0_10 = arith.constant 0 : index
    %31 = vector.load %arg4[%c0_9, %c0_10] : memref<8x32xf32, #tpu.memory_space<vmem>>, vector<8x32xf32>
    tpu.vector_store %arg4[%c0_9, %c0_10], %30 {strides = array<i32>} : memref<8x32xf32, #tpu.memory_space<vmem>>, vector<8x32xf32>,
    return
  }
  func.func @transform_0(%arg0: i32) -> (i32, i32) {
    %c0_i32 = arith.constant 0 : i32
    %c0_i32_0 = arith.constant 0 : i32
    return %arg0, %c0_i32 : i32, i32
  }
  func.func @transform_1(%arg0: i32) -> i32 {
    %c0_i32 = arith.constant 0 : i32
    %c0_i32_0 = arith.constant 0 : i32
    return %c0_i32 : i32
  }
  func.func @transform_2(%arg0: i32) -> i32 {
    %c0_i32 = arith.constant 0 : i32
    %c0_i32_0 = arith.constant 0 : i32
    return %c0_i32 : i32
  }
  func.func @transform_3(%arg0: i32) -> (i32, i32) {
    %c0_i32 = arith.constant 0 : i32
    %c0_i32_0 = arith.constant 0 : i32
    return %arg0, %c0_i32 : i32, i32
  }
}

</mosaic_0001>

<bundles_post_ra>
// kernel: tpu_custom_call.1
= control target key start
LH: loop header
LB: loop body
LE: loop exit
PB: predicated region body
PF: predicated region fallthrough
CT: control target
= control target key end

     0   :  { %s638_s0 = inlined_call_operand.hbm [shape: f32[16,32], index: 0, kind: input, shape index: {}]   ;;  %s639_s1 = inlined_call_operand.<no memory space> [shape: f32[1], index: 1, kind: input, shape index: {}]   ;;  %s640_s2 = inlined_call_operand.<no memory space> [shape: f32[1], index: 2, kind: input, shape index: {}]   ;;  %s641_s3 = inlined_call_operand.hbm [shape: f32[16,32], index: 3, kind: output, shape index: {}]  }
   0x1   :  { %8 = sst [smem:[#allocation2]] %s639_s1 }
   0x2   :  { %9 = sst [smem:[#allocation3]] %s640_s2 }
   0x3   :  { %10 = vsyncpa [#allocation5], 0 }
   0x4   :  { %12 = vsyncpa [#allocation5 + $0x1], 0 }
   0x5   :  { %13 = vsyncpa [#allocation6], 0 }
   0x6   :  { %15 = vsyncpa [#allocation6 + $0x1], 0  ;;  %s490_s16 = smov 0   ;;  %s492_s17 = smov 0  }
   0x7   :  { %s494_s18 = smov 0   ;;  %s496_s19 = smov 0  }
   0x8 LB: > { %s511_s1 = sadd.s32 4294967295, %s460_s19   ;;  %s306_s2 = sadd.s32 4294967294, %s460_s19   ;;  %s460_s19 = sphi %s496_s19, %s658_s19   ;;  %s456_s18 = sphi %s494_s18, %s657_s18   ;;  %s452_s17 = sphi %s492_s17, %s656_s17   ;;  %s448_s16 = sphi %s490_s16, %s655_s16  }
   0x9   : > { %s515_s20 = sadd.s32 1, %s460_s19   ;;  %s28_s21 = sadd.s32 1, %s456_s18 }
   0xa   : > { %s25_s22 = ssub.s32 %s460_s19, %s515_s20  ;;  %p35_p0 = scmp.ne.s32.totalorder %s456_s18, %s452_s17 }
   0xb   : > { %p26_p1 = scmp.eq.s32.totalorder %s25_s22, 0  ;;  %p36_p2 = scmp.eq.s32.totalorder %s460_s19, 0 }
   0xc   : > { %p41_p3 = scmp.ne.s32.totalorder %s452_s17, %s448_s16  ;;  %p42_p4 = scmp.eq.s32.totalorder %s511_s1, 0 }
   0xd   : > { %s527_s23 = scalar_select %p26_p1, %s456_s18, %s28_s21  }
   0xe   : > { %p529_p5 = por %p36_p2, %p35_p0  ;;  %p533_p6 = por %p42_p4, %p41_p3 }
   0xf   : > { %p107_p7 = scmp.eq.s32.totalorder %s511_s1, 1  ;;  %p113_p8 = scmp.eq.s32.totalorder %s306_s2, 1 }
  0x10   : > { %s645_s25 = scalar_select %p533_p6, 1, 0 }
  0x11   : > { %p330_p10 = scmp.lt.s32.totalorder %s460_s19, 2  ;;  %p540_p11 = por %p107_p7, %p35_p0 }
  0x12   : > { %p544_p12 = por %p113_p8, %p41_p3  ;;  %s139_s28 = sand.u32 1, %s456_s18  }
  0x13   : > { %s646_s26 = scalar_select %p540_p11, 1, 0 }
  0x14   : > { %s647_s27 = scalar_select %p544_p12, 1, 0 }
  0x15   : > { %s310_s29 = sshll.u32 %s460_s19, 7  ;;  %s309_s30 = sshll.u32 %s139_s28, 3 }
  0x16   : > { %s553_s6 = scalar_lea.hbm %s638_s0, %s310_s29  ;;  %s143_s7 = scalar_lea.vmem [#allocation4], %s309_s30 }
  0x17   : > { %s150_s8 = sshll.u32 %s143_s7, 4  ;;  %p557_p13 = pnand %p330_p10, %p529_p5  ;;  %s561_s8 = int_to_ptr.vmem [resolvable:$true] %s150_s8 }
  0x18   : > { %s140_s10 = scalar_lea.sflag [#allocation5], %s139_s28  ;;  %s368_s11 = scalar_lea.hbm %s553_s6, 128 }
  0x19   : > { %p369_p2 = scmp.ne.s32.totalorder %s553_s6, %s368_s11  ;;  %p370_p3 = pneg %p557_p13 }
  0x1a   : > { %s373_s14 = scalar_lea.hbm %s638_s0, 256  ;;  %p374_p5 = scmp.lt.s32.totalorder %s553_s6, %s638_s0 }
  0x1b   : > { %p371_p4 = pnand %p370_p3, %p369_p2  ;;  %p375_p8 = scmp.lt.s32.totalorder %s373_s14, %s368_s11 }
  0x1d   : > { %p372_p7 = pneg %p371_p4  ;;  %p376_p10 = por %p375_p8, %p374_p5 }
  0x1f   : > { %p377_p9 = pnand %p376_p10, %p372_p7 }
  0x21   : > { %380 = shalt.err (!%p377_p9)
}
  0x22   : > { %s381_s21 = scalar_lea.vmem %s561_s8, 128  ;;  %s462_s22 = smov [#allocation4]  }
  0x23   : > { %p382_p0 = scmp.ne.s32.totalorder %s561_s8, %s381_s21  ;;  %s386_s24 = sshll.u32 %s462_s22, 4  ;;  %s387_s24 = int_to_ptr.vmem [resolvable:$false] %s386_s24 }
  0x24   : > { %s388_s28 = scalar_lea.vmem %s387_s24, 256  ;;  %p389_p4 = scmp.lt.s32.totalorder %s561_s8, %s387_s24 }
  0x25   : > { %p384_p1 = pnand %p382_p0, %p370_p3  ;;  %p390_p12 = scmp.lt.s32.totalorder %s388_s28, %s381_s21 }
  0x27   : > { %p385_p2 = pneg %p384_p1  ;;  %p391_p11 = por %p390_p12, %p389_p4 }
  0x29   : > { %p392_p6 = pnand %p391_p11, %p385_p2 }
  0x2b   : > { %395 = shalt.err (!%p392_p6)
}
  0x2c   : > { %325 = dma.hbm_to_vmem [thread:$0]  (!%p557_p13), %s553_s6, 128, %s561_s8, %s140_s10  }
  0x2d   : > { %p649_p9 = scmp.lt.s32.totalorder %s460_s19, 3  ;;  %p650_p7 = scmp.ge.s32.totalorder %s460_s19, 1 }
  0x2f   : > { %p156_p0 = pnand %p650_p7, %p649_p9 }
  0x30   : > { %s588_s29 = sand.u32 (!%p156_p0), 1, %s452_s17   ;;  %p651_p6 = scmp.ne.s32.totalorder (!%p156_p0), %s645_s25, 0 }
  0x31   : > { %159 = sbr.rel (%p156_p0) target bundleno = 262 (0x106), region = 32  ;;  %s312_s30 = sshll.u32 (!%p156_p0), %s588_s29, 3 }
  0x32   : > { %s162_s4 = scalar_lea.sflag (!%p156_p0), [#allocation5], %s588_s29  ;;  %s165_s5 = scalar_lea.vmem (!%p156_p0), [#allocation4], %s312_s30 }
  0x36   : > { %439 = dma.done.wait (%p651_p6), %s162_s4, 128  }
  0x37   : > { %441 = vsyncadd (%p651_p6), %s162_s4, 4294967168  ;;  %vm189_vm0 = vcmask 261120   ;;  %v188_v0 = vld [vmem:[%s165_s5] sm:$0xff]  ;;  %s212_s25 = sld [smem:[#allocation2]]  ;;  %s315_s7 = sshll.u32 %s511_s1, 7 }
  0x38   : > { %v190_v1 = vsel %vm189_vm0, %v188_v0, 0.0  ;;  %v193_v2 = vmul.f32 %v188_v0, %v188_v0  ;;  %s215_s6 = sld [smem:[#allocation3]]  ;;  %s187_s8 = scalar_lea.vmem [#allocation7], %s312_s30 }
  0x39   : > { %191 = vadd.xlane.f32.xlu0 %v190_v1  ;;  %s236_s9 = sshll.u32 %s187_s8, 4  ;;  %s234_s12 = scalar_lea.hbm %s641_s3, %s315_s7  ;;  %s237_s9 = int_to_ptr.vmem [resolvable:$true] %s236_s9 }
  0x3a   : > { %v194_v3 = vsel %vm189_vm0, %v193_v2, 0.0  ;;  %s223_s13 = scalar_lea.sflag [#allocation6], %s588_s29  ;;  %s396_s14 = scalar_lea.vmem %s237_s9, 128 }
  0x3b   : > { %p397_p11 = scmp.ne.s32.totalorder %s237_s9, %s396_s14  ;;  %p652_p12 = scmp.ne.s32.totalorder %s646_s26, 0 }
  0x3c   : > { %s463_s1 = smov [#allocation7]  }
  0x3d   : > { %195 = vadd.xlane.f32.xlu0 %v194_v3  ;;  %v213_v18 = vstv %s212_s25  ;;  %p398_p13 = pnand %p397_p11, %p652_p12  ;;  %s400_s15 = sshll.u32 %s463_s1, 4  ;;  %s401_s15 = int_to_ptr.vmem [resolvable:$false] %s400_s15 }
  0x3e   : > { %v217_v21 = vstv %s215_s6  ;;  %s402_s2 = scalar_lea.vmem %s401_s15, 256  ;;  %p403_p3 = scmp.lt.s32.totalorder %s237_s9, %s401_s15 }
  0x3f   : > { %p399_p1 = pneg %p398_p13  ;;  %p404_p5 = scmp.lt.s32.totalorder %s402_s2, %s396_s14 }
  0x41   : > { %p405_p8 = por %p404_p5, %p403_p3 }
  0x43   : > { %p406_p10 = pnand %p405_p8, %p399_p1 }
  0xc2   : > { %v192_v4 = vpop.xlane.xlu0 %191 }
  0xc3   : > { %v197_v5 = vmul.f32 0.03125, %v192_v4 }
  0xc5   : > { %v198_v6 = vmul.f32 32.0, %v197_v5 }
  0xc6   : > { %v196_v7 = vpop.xlane.xlu0 %195 }
  0xc7   : > { %v199_v8 = vmul.f32 %v198_v6, %v197_v5 }
  0xc9   : > { %v200_v9 = vsub.f32 %v196_v7, %v199_v8 }
  0xcb   : > { %v201_v10 = vmul.f32 0.032258064, %v200_v9 }
  0xcd   : > { %v202_v11 = vmax.f32 %v201_v10, 0.0 }
  0xcf   : > { %364 = vrsqrt.f32 %v202_v11  ;;  %vm205_vm1 = vcmp.eq.f32.partialorder %v202_v11, inf  ;;  %v208_v14 = vand.u32 2147483648, %v202_v11  ;;  %vm207_vm2 = vcmp.eq.f32.partialorder %v202_v11, 0.0 }
  0xdc   : > { %v365_v12 = vpop.eup %364 }
  0xdd   : > { %v204_v13 = vmul.f32 %v365_v12, %v202_v11 }
  0xdf   : > { %v206_v15 = vsel %vm205_vm1, %v202_v11, %v204_v13 }
  0xe0   : > { %v209_v16 = vsel %vm207_vm2, %v208_v14, %v206_v15 }
  0xe1   : > { %v210_v17 = vadd.f32 1e-06, %v209_v16 }
  0xe3   : > { %366 = vrcp.f32 %v210_v17 }
  0xf0   : > { %v367_v19 = vpop.eup %366 }
  0xf1   : > { %v214_v20 = vmul.f32 %v367_v19, %v213_v18 }
  0xf3   : > { %v216_v22 = vmul.f32 %v214_v20, %v197_v5  ;;  %v219_v24 = vmul.f32 %v214_v20, %v188_v0 }
  0xf5   : > { %v218_v23 = vsub.f32 %v217_v21, %v216_v22 }
  0xf7   : > { %v220_v25 = vadd.f32 %v219_v24, %v218_v23 }
  0xf9   : > { %221 = vst.msk [vmem:[%s187_s8] sm:$0xff] %vm189_vm0, %v220_v25 }
  0xfa   : > { %409 = shalt.err (!%p406_p10)
}
  0xfb   : > { %s410_s21 = scalar_lea.hbm %s234_s12, 128  ;;  %s414_s28 = scalar_lea.hbm %s641_s3, 256 }
  0xfc   : > { %p411_p2 = scmp.ne.s32.totalorder %s234_s12, %s410_s21  ;;  %p415_p7 = scmp.lt.s32.totalorder %s234_s12, %s641_s3 }
  0xfd   : > { %p416_p0 = scmp.lt.s32.totalorder %s414_s28, %s410_s21 }
  0xfe   : > { %p412_p4 = pnand %p411_p2, %p652_p12 }
  0xff   : > { %p417_p6 = por %p416_p0, %p415_p7 }
 0x100   : > { %p413_p9 = pneg %p412_p4 }
 0x102   : > { %p418_p11 = pnand %p417_p6, %p413_p9 }
 0x104   : > { %421 = shalt.err (!%p418_p11)
}
 0x105   : > { %320 = dma.vmem_to_hbm [thread:$0]  (%p652_p12), %s237_s9, 128, %s234_s12, %s223_s13  }
 0x106 PF: > { %s248_s4 = sand.u32 1, %s448_s16   ;;  %p653_p13 = scmp.ne.s32.totalorder %s647_s27, 0 }
 0x107   : > { %p654_p1 = scmp.ge.s32.totalorder %s460_s19, 2  ;;  %s249_s5 = scalar_lea.sflag [#allocation6], %s248_s4 }
 0x109   : > { %p327_p3 = pnand %p654_p1, %p653_p13 }
 0x10b   : > { %p328_p5 = pneg %p327_p3 }
 0x10d   : > { %443 = dma.done.wait (%p328_p5), %s249_s5, 128  }
 0x10e   : > { %445 = vsyncadd (%p328_p5), %s249_s5, 4294967168  ;;  %p18_p8 = scmp.ge.s32.totalorder %s515_s20, 4   ;;  %s655_s16 = smov %s452_s17 }
 0x10f   : > { %s656_s17 = smov %s456_s18  ;;  %s657_s18 = smov %s527_s23 }
 0x110   : > { %s658_s19 = smov %s515_s20  ;;  %20 = sbr.rel (!%p18_p8) target bundleno = 8 (0x8), region = 77 }
 0x115   :  { %254 = vsyncpa [#allocation5], 1 }
 0x116   :  { %256 = vsyncpa [#allocation5 + $0x1], 1 }
 0x117   :  { %257 = vsyncpa [#allocation6], 1 }
 0x118   :  { %259 = vsyncpa [#allocation6 + $0x1], 1 }

</bundles_post_ra>
